<compile_context>
chip_gen: v6e
topology: v6e:2x2x1
jax: 0.10.0
libtpu: 0.0.40
codegen_flags: <defaults>
</compile_context>

<pallas_src>
import jax
import jax.numpy as jnp
from jax.experimental import pallas as pl
from jax.experimental.pallas import tpu as pltpu

_LANE = 128
_SUBLANE = 8
_MIN_SPLIT_TB = 512  # lanes; only split a single tile in two if each half >= this


def dqn_kernel(xT_ref, w1_ref, b1_ref, w2_ref, b2_ref, w3_ref, b3_ref, oT_ref):
    # One batch tile (TB lanes) per grid step; all matmuls + ReLUs stay in
    # VMEM/vregs.  Weights are PyTorch-layout [out, in], so h^T = W @ x^T.
    xT = xT_ref[...]                                                      # [S, TB]
    h1 = jnp.dot(w1_ref[...], xT, preferred_element_type=jnp.float32) + b1_ref[...]
    h1 = jnp.maximum(h1, 0.0)                                             # [H, TB]
    h2 = jnp.dot(w2_ref[...], h1, preferred_element_type=jnp.float32) + b2_ref[...]
    h2 = jnp.maximum(h2, 0.0)                                             # [H, TB]
    out = jnp.dot(w3_ref[...], h2, preferred_element_type=jnp.float32) + b3_ref[...]
    oT_ref[...] = out.astype(oT_ref.dtype)                                # [A_pad, TB]


def dqn_forward(x, params, *, block_b=2048):
    """x: [B, state_space] float32.

    params: dict of W1,b1,W2,b2,W3,b3 in PyTorch nn.Linear layout
    (W: [out_features, in_features], b: [out_features, 1]).
    Returns Q-values [B, action_space].
    """
    assert block_b % _LANE == 0, "block_b must be a multiple of 128 lanes"
    B, S = x.shape
    H = params["W1"].shape[0]
    A = params["W3"].shape[0]

    # ---- Pad action rows to a full sublane group -> unmasked [A_pad, TB] stores.
    A_pad = pl.cdiv(A, _SUBLANE) * _SUBLANE
    W3p = jnp.pad(params["W3"], ((0, A_pad - A), (0, 0)))
    b3p = jnp.pad(params["b3"], ((0, A_pad - A), (0, 0)))

    # ---- Batch-in-lanes tiling: batch axis -> lanes, multiple of 128. --------
    B_lane = pl.cdiv(B, _LANE) * _LANE
    n = pl.cdiv(B_lane, block_b)
    if n == 1 and B_lane >= 2 * _MIN_SPLIT_TB:
        n = 2                      # keep both v7x TensorCores busy
    elif n > 1 and n % 2 == 1:
        n += 1                     # even tile count -> balanced megacore split
    TB = pl.cdiv(pl.cdiv(B_lane, n), _LANE) * _LANE
    B_pad = n * TB

    xT = jnp.pad(x.T, ((0, 0), (0, B_pad - B)))          # [S, B_pad]

    const = lambda shape: pl.BlockSpec(shape, lambda i: (0, 0))  # VMEM-resident

    outT = pl.pallas_call(
        dqn_kernel,
        out_shape=jax.ShapeDtypeStruct((A_pad, B_pad), jnp.float32),
        grid_spec=pltpu.PrefetchScalarGridSpec(
            num_scalar_prefetch=0,
            grid=(n,),
            in_specs=[
                pl.BlockSpec((S, TB), lambda i: (0, i)),   # x^T: tiled over batch lanes
                const((H, S)),                             # W1 [24, S]
                const((H, 1)),                             # b1 [24, 1]
                const((H, H)),                             # W2 [24, 24]
                const((H, 1)),                             # b2 [24, 1]
                const((A_pad, H)),                         # W3 (sublane-padded) [8, 24]
                const((A_pad, 1)),                         # b3 (sublane-padded) [8, 1]
            ],
            out_specs=pl.BlockSpec((A_pad, TB), lambda i: (0, i)),
        ),
        compiler_params=pltpu.CompilerParams(
            dimension_semantics=("parallel",),  # batch tiles split across TCs (v7x)
        ),
    )(xT, params["W1"], params["b1"], params["W2"], params["b2"], W3p, b3p)

    # Tiny [A_pad, B_pad] slab (e.g. 32 KB at B=1000); slice+transpose is cheap.
    return outT[:A, :B].T


def init_params(key, state_space, action_space, hidden=24):
    """Deterministic init mirroring nn.Linear's default U(-1/sqrt(fan_in), +1/sqrt(fan_in)).

    Weights are kept in PyTorch layout [out_features, in_features]; biases [out, 1].
    """
    def linear_init(k, fan_in, fan_out):
        kw, kb = jax.random.split(k)
        bound = 1.0 / jnp.sqrt(jnp.float32(fan_in))
        W = jax.random.uniform(kw, (fan_out, fan_in), jnp.float32, -bound, bound)
        b = jax.random.uniform(kb, (fan_out, 1), jnp.float32, -bound, bound)
        return W, b

    k1, k2, k3 = jax.random.split(key, 3)
    W1, b1 = linear_init(k1, state_space, hidden)
    W2, b2 = linear_init(k2, hidden, hidden)
    W3, b3 = linear_init(k3, hidden, action_space)
    return {"W1": W1, "b1": b1, "W2": W2, "b2": b2, "W3": W3, "b3": b3}


def dqn_reference(x, p):
    h1 = jnp.maximum(x @ p["W1"].T + p["b1"].T, 0.0)
    h2 = jnp.maximum(h1 @ p["W2"].T + p["b2"].T, 0.0)
    return h2 @ p["W3"].T + p["b3"].T


if __name__ == "__main__":
    key = jax.random.PRNGKey(0)
    kx, kp, kx2 = jax.random.split(key, 3)

    batch = 8
    state_space = 4     # e.g. CartPole observation dim
    action_space = 2    # e.g. CartPole action dim

    x = jax.random.normal(kx, (batch, state_space), dtype=jnp.float32)
    params = init_params(kp, state_space, action_space)

    # Small path (single grid step, B=8 padded to 128 lanes).
    out = jax.block_until_ready(dqn_forward(x, params))
    ref = dqn_reference(x, params)
    assert out.shape == (batch, action_space)
    assert jnp.allclose(out, ref, atol=1e-5, rtol=1e-5), "mismatch vs reference (B=8)"

    # Larger, non-aligned batch exercises the 2-tile grid + lane-padding path.
    big_b = 1000
    xb = jax.random.normal(kx2, (big_b, state_space), dtype=jnp.float32)
    out_b = jax.block_until_ready(dqn_forward(xb, params))
    ref_b = dqn_reference(xb, params)
    assert out_b.shape == (big_b, action_space)
    assert jnp.allclose(out_b, ref_b, atol=1e-5, rtol=1e-5), "mismatch vs reference (B=1000)"

    print("KERNEL_OK")
</pallas_src>

<mosaic_0001>
module attributes {stable_mosaic.version = 11 : i64} {
  func.func @dqn_kernel(%arg0: i32, %arg1: memref<4x128xf32, #tpu.memory_space<vmem>>, %arg2: memref<24x4xf32, #tpu.memory_space<vmem>>, %arg3: memref<24x1xf32, #tpu.memory_space<vmem>>, %arg4: memref<24x24xf32, #tpu.memory_space<vmem>>, %arg5: memref<24x1xf32, #tpu.memory_space<vmem>>, %arg6: memref<8x24xf32, #tpu.memory_space<vmem>>, %arg7: memref<8x1xf32, #tpu.memory_space<vmem>>, %arg8: memref<8x128xf32, #tpu.memory_space<vmem>>) attributes {dimension_semantics = [#tpu.dimension_semantics<parallel>], iteration_bounds = array<i64: 1>, scalar_prefetch = 0 : i64, scratch_operands = 0 : i64, tpu.core_type = #tpu.core_type<tc>, window_params = [{transform_indices = @transform_0, window_bounds = array<i64: 4, 128>}, {pipeline_mode = #tpu.pipeline_mode<synchronous>, transform_indices = @transform_1, window_bounds = array<i64: 24, 4>}, {pipeline_mode = #tpu.pipeline_mode<synchronous>, transform_indices = @transform_2, window_bounds = array<i64: 24, 1>}, {pipeline_mode = #tpu.pipeline_mode<synchronous>, transform_indices = @transform_3, window_bounds = array<i64: 24, 24>}, {pipeline_mode = #tpu.pipeline_mode<synchronous>, transform_indices = @transform_4, window_bounds = array<i64: 24, 1>}, {pipeline_mode = #tpu.pipeline_mode<synchronous>, transform_indices = @transform_5, window_bounds = array<i64: 8, 24>}, {pipeline_mode = #tpu.pipeline_mode<synchronous>, transform_indices = @transform_6, window_bounds = array<i64: 8, 1>}, {transform_indices = @transform_7, window_bounds = array<i64: 8, 128>}]} {
    %c0 = arith.constant 0 : index
    %c0_0 = arith.constant 0 : index
    %0 = vector.load %arg1[%c0, %c0_0] : memref<4x128xf32, #tpu.memory_space<vmem>>, vector<4x128xf32>
    %c0_1 = arith.constant 0 : index
    %c0_2 = arith.constant 0 : index
    %1 = vector.load %arg2[%c0_1, %c0_2] : memref<24x4xf32, #tpu.memory_space<vmem>>, vector<24x4xf32>
    %cst = arith.constant dense<0.000000e+00> : vector<24x128xf32>
    %2 = tpu.matmul %1, %0, %cst {dimension_numbers = #tpu.dot_dimension_numbers<[1], [0], [0], [1], [0, 0, 1, 1], [], []>} : vector<24x4xf32>, vector<4x128xf32>, vector<24x128xf32> -> vector<24x128xf32>
    %c0_3 = arith.constant 0 : index
    %c0_4 = arith.constant 0 : index
    %3 = vector.load %arg3[%c0_3, %c0_4] : memref<24x1xf32, #tpu.memory_space<vmem>>, vector<24x1xf32>
    %4 = vector.broadcast %3 : vector<24x1xf32> to vector<24x128xf32>
    %5 = arith.addf %2, %4 : vector<24x128xf32>
    %cst_5 = arith.constant 0.000000e+00 : f32
    %6 = vector.broadcast %cst_5 : f32 to vector<24x128xf32>
    %7 = arith.maximumf %5, %6 : vector<24x128xf32>
    %c0_6 = arith.constant 0 : index
    %c0_7 = arith.constant 0 : index
    %8 = vector.load %arg4[%c0_6, %c0_7] : memref<24x24xf32, #tpu.memory_space<vmem>>, vector<24x24xf32>
    %cst_8 = arith.constant dense<0.000000e+00> : vector<24x128xf32>
    %9 = tpu.matmul %8, %7, %cst_8 {dimension_numbers = #tpu.dot_dimension_numbers<[1], [0], [0], [1], [0, 0, 1, 1], [], []>} : vector<24x24xf32>, vector<24x128xf32>, vector<24x128xf32> -> vector<24x128xf32>
    %c0_9 = arith.constant 0 : index
    %c0_10 = arith.constant 0 : index
    %10 = vector.load %arg5[%c0_9, %c0_10] : memref<24x1xf32, #tpu.memory_space<vmem>>, vector<24x1xf32>
    %11 = vector.broadcast %10 : vector<24x1xf32> to vector<24x128xf32>
    %12 = arith.addf %9, %11 : vector<24x128xf32>
    %cst_11 = arith.constant 0.000000e+00 : f32
    %13 = vector.broadcast %cst_11 : f32 to vector<24x128xf32>
    %14 = arith.maximumf %12, %13 : vector<24x128xf32>
    %c0_12 = arith.constant 0 : index
    %c0_13 = arith.constant 0 : index
    %15 = vector.load %arg6[%c0_12, %c0_13] : memref<8x24xf32, #tpu.memory_space<vmem>>, vector<8x24xf32>
    %cst_14 = arith.constant dense<0.000000e+00> : vector<8x128xf32>
    %16 = tpu.matmul %15, %14, %cst_14 {dimension_numbers = #tpu.dot_dimension_numbers<[1], [0], [0], [1], [0, 0, 1, 1], [], []>} : vector<8x24xf32>, vector<24x128xf32>, vector<8x128xf32> -> vector<8x128xf32>
    %c0_15 = arith.constant 0 : index
    %c0_16 = arith.constant 0 : index
    %17 = vector.load %arg7[%c0_15, %c0_16] : memref<8x1xf32, #tpu.memory_space<vmem>>, vector<8x1xf32>
    %18 = vector.broadcast %17 : vector<8x1xf32> to vector<8x128xf32>
    %19 = arith.addf %16, %18 : vector<8x128xf32>
    %c0_17 = arith.constant 0 : index
    %c0_18 = arith.constant 0 : index
    %20 = vector.load %arg8[%c0_17, %c0_18] : memref<8x128xf32, #tpu.memory_space<vmem>>, vector<8x128xf32>
    tpu.vector_store %arg8[%c0_17, %c0_18], %19 {strides = array<i32>} : memref<8x128xf32, #tpu.memory_space<vmem>>, vector<8x128xf32>,
    return
  }
  func.func @transform_0(%arg0: i32) -> (i32, i32) {
    %c0_i32 = arith.constant 0 : i32
    %c0_i32_0 = arith.constant 0 : i32
    return %c0_i32, %arg0 : i32, i32
  }
  func.func @transform_1(%arg0: i32) -> (i32, i32) {
    %c0_i32 = arith.constant 0 : i32
    %c0_i32_0 = arith.constant 0 : i32
    %c0_i32_1 = arith.constant 0 : i32
    return %c0_i32, %c0_i32_0 : i32, i32
  }
  func.func @transform_2(%arg0: i32) -> (i32, i32) {
    %c0_i32 = arith.constant 0 : i32
    %c0_i32_0 = arith.constant 0 : i32
    %c0_i32_1 = arith.constant 0 : i32
    return %c0_i32, %c0_i32_0 : i32, i32
  }
  func.func @transform_3(%arg0: i32) -> (i32, i32) {
    %c0_i32 = arith.constant 0 : i32
    %c0_i32_0 = arith.constant 0 : i32
    %c0_i32_1 = arith.constant 0 : i32
    return %c0_i32, %c0_i32_0 : i32, i32
  }
  func.func @transform_4(%arg0: i32) -> (i32, i32) {
    %c0_i32 = arith.constant 0 : i32
    %c0_i32_0 = arith.constant 0 : i32
    %c0_i32_1 = arith.constant 0 : i32
    return %c0_i32, %c0_i32_0 : i32, i32
  }
  func.func @transform_5(%arg0: i32) -> (i32, i32) {
    %c0_i32 = arith.constant 0 : i32
    %c0_i32_0 = arith.constant 0 : i32
    %c0_i32_1 = arith.constant 0 : i32
    return %c0_i32, %c0_i32_0 : i32, i32
  }
  func.func @transform_6(%arg0: i32) -> (i32, i32) {
    %c0_i32 = arith.constant 0 : i32
    %c0_i32_0 = arith.constant 0 : i32
    %c0_i32_1 = arith.constant 0 : i32
    return %c0_i32, %c0_i32_0 : i32, i32
  }
  func.func @transform_7(%arg0: i32) -> (i32, i32) {
    %c0_i32 = arith.constant 0 : i32
    %c0_i32_0 = arith.constant 0 : i32
    return %c0_i32, %arg0 : i32, i32
  }
}

</mosaic_0001>

<bundles_post_ra>
// kernel: tpu_custom_call.1
= control target key start
LH: loop header
LB: loop body
LE: loop exit
PB: predicated region body
PF: predicated region fallthrough
CT: control target
= control target key end

     0   :  { %vm59_vm0 = vcmask 1043456   ;;  %v440_v2 = vmov 0.0   ;;  %vm441_vm1 = vmmov 0   ;;  %vm49_vm2 = vcmask 31744   ;;  %s560_s0 = inlined_call_operand.vmem [shape: f32[4,128], index: 0, kind: input, shape index: {}]   ;;  %s561_s1 = inlined_call_operand.vmem [shape: f32[24,4], index: 1, kind: input, shape index: {}]   ;;  %s562_s2 = inlined_call_operand.vmem [shape: f32[24,1], index: 2, kind: input, shape index: {}]   ;;  %s563_s3 = inlined_call_operand.vmem [shape: f32[24,24], index: 3, kind: input, shape index: {}]   ;;  %s564_s4 = inlined_call_operand.vmem [shape: f32[24,1], index: 4, kind: input, shape index: {}]   ;;  %s565_s5 = inlined_call_operand.vmem [shape: f32[8,24], index: 5, kind: input, shape index: {}]   ;;  %s566_s6 = inlined_call_operand.vmem [shape: f32[8,1], index: 6, kind: input, shape index: {}]   ;;  %s567_s7 = inlined_call_operand.hbm [shape: f32[8,128], index: 7, kind: output, shape index: {}]  }
   0x1   :  { %v27_v0 = vld [vmem:[%s560_s0] sm:$0xf]  ;;  %377 = vmatprep.subr.mxu0 %v440_v2  ;;  %379 = vmatprep.mubr.msk.f32.mxu0 %vm441_vm1, %v440_v2  ;;  %v33_v3 = vld [vmem:[%s562_s2 + $0x10] sm:$0xff]  ;;  %v442_v4 = vmov 0   ;;  %v29_v6 = vld [vmem:[%s561_s1 + $0x8] sm:$0xff] }
   0x2   :  { %v28_v1 = vld [vmem:[%s561_s1] sm:$0xff]  ;;  %378 = vmatpush3.msk.msra.mxu0 %vm59_vm0, %v27_v0  ;;  %416 = vset.pattern.permute.xlu0 %v442_v4  ;;  %v32_v7 = vld [vmem:[%s562_s2 + $0x8] sm:$0xff] }
   0x3   :  { %v31_v5 = vld [vmem:[%s562_s2] sm:$0xff]  ;;  %380 = vmatmul.mubr.msk.f32.vlgmr.msra.gmra.mxu0 %vm49_vm2, %v28_v1  ;;  %46 = vperm.xlu0 %416, %v33_v3  }
   0x4   :  { %382 = vmatprep.mubr.msk.f32.mxu0 %vm441_vm1, %v440_v2  ;;  %417 = vset.pattern.permute.xlu1 %v442_v4 }
   0x5   :  { %12 = vsyncpa [#allocation3], 0  ;;  %36 = vperm.xlu1 %417, %v31_v5   ;;  %388 = vmatprep.subr.mxu1 %v440_v2  ;;  %v151_v8 = vld [vmem:[%s564_s4 + $0x10] sm:$0xff]  ;;  %v150_v10 = vld [vmem:[%s564_s4 + $0x8] sm:$0xff]  ;;  %vm167_vm3 = vcmask 195584   ;;  %s443_s25 = smov [#allocation2]  }
   0x6   :  { %394 = vmatprep.mubr.msk.f32.mxu1 %vm441_vm1, %v440_v2  ;;  %403 = vmatprep.subr.mxu0 %v440_v2  ;;  %v30_v9 = vld [vmem:[%s561_s1 + $0x10] sm:$0xff]  ;;  %v149_v11 = vld [vmem:[%s564_s4] sm:$0xff]  ;;  %v147_v29 = vld [vmem:[%s563_s3 + $0x8] sm:$0xff]  ;;  %s347_s26 = sshll.u32 %s443_s25, 4  ;;  %s348_s26 = int_to_ptr.vmem [resolvable:$true] %s347_s26 }
   0x7   :  { %383 = vmatmul.mubr.msk.f32.gmra.mxu0 %vm49_vm2, %v29_v6  ;;  %41 = vperm.xlu0 %416, %v32_v7   ;;  %v261_v12 = vld [vmem:[%s566_s6] sm:$0xff]  ;;  %v148_v30 = vld [vmem:[%s563_s3 + $0x10] sm:$0xff]  ;;  %s418_s27 = scalar_lea.vmem %s348_s26, 128  ;;  %p423_p1 = scmp.lt.s32.totalorder %s348_s26, %s348_s26 }
   0x8   :  { %385 = vmatprep.mubr.msk.f32.mxu0 %vm441_vm1, %v440_v2  ;;  %v146_v28 = vld [vmem:[%s563_s3] sm:$0xff]  ;;  %p419_p0 = scmp.ne.s32.totalorder %s348_s26, %s418_s27  ;;  %p424_p2 = scmp.lt.s32.totalorder %s418_s27, %s418_s27 }
   0x9   :  { %164 = vperm.xlu1 %417, %v151_v8   ;;  %v260_v46 = vld [vmem:[%s565_s5] sm:$0xff] }
   0xa   :  { %p425_p3 = por %p424_p2, %p423_p1 }
   0xb   :  { %386 = vmatmul.mubr.msk.f32.gmra.mxu0 %vm49_vm2, %v30_v9  ;;  %159 = vperm.xlu0 %416, %v150_v10  }
   0xc   :  { %409 = vmatprep.mubr.msk.f32.mxu0 %vm441_vm1, %v440_v2  ;;  %p426_p4 = pnand %p425_p3, %p419_p0 }
   0xd   :  { %154 = vperm.xlu1 %417, %v149_v11  }
   0xf   :  { %264 = vperm.xlu0 %416, %v261_v12  }
  0x7e   :  { %v47_v14 = vpop.permute.xlu0 %46 }
  0x80   :  { %v37_v18 = vpop.permute.xlu1 %36 }
  0x82   :  { %v42_v19 = vpop.permute.xlu0 %41 }
  0x84   :  { %v165_v33 = vpop.permute.xlu1 %164 }
  0x86   :  { %v160_v36 = vpop.permute.xlu0 %159 }
  0x88   :  { %v155_v40 = vpop.permute.xlu1 %154 }
  0x8a   :  { %v265_v47 = vpop.permute.xlu0 %264 }
  0xc3   :  { %v129_v13 = vpop.f32.mrf.mxu0 }
  0xc4   :  { %v130_v24 = vadd.f32 %v129_v13, %v37_v18 }
  0xc5   :  { %v381_v15 = vpop.f32.mrf.mxu0 }
  0xc6   :  { %v143_v27 = vmax.f32 %v130_v24, 0.0 }
  0xc7   :  { %v134_v16 = vpop.f32.mrf.mxu0 }
  0xc8   :  { %v135_v21 = vadd.f32 %v134_v16, %v42_v19 }
  0xc9   :  { %v384_v17 = vpop.f32.mrf.mxu0 }
  0xca   :  { %v144_v26 = vmax.f32 %v135_v21, 0.0 }
  0xcb   :  { %v139_v20 = vpop.f32.mrf.mxu0 }
  0xcc   :  { %v140_v22 = vadd.f32 %v139_v20, %v47_v14 }
  0xcd   :  { %v387_v23 = vpop.f32.mrf.mxu0 }
  0xce   :  { %v145_v25 = vmax.f32 %v140_v22, 0.0 }
  0xd0   :  { %389 = vmatpush3.msra.mxu1 %v145_v25 }
  0xd1   :  { %390 = vmatprep.subr.mxu1 %v440_v2 }
  0xd2   :  { %391 = vmatpush3.msra.mxu1 %v144_v26 }
  0xd3   :  { %392 = vmatprep.subr.mxu1 %v440_v2 }
  0xd4   :  { %393 = vmatpush3.msra.mxu1 %v143_v27 }
  0xd5   :  { %395 = vmatmul.mubr.msk.f32.vlgmr.msra.gmra.mxu1 %vm167_vm3, %v146_v28 }
  0xd6   :  { %397 = vmatprep.mubr.msk.f32.mxu1 %vm441_vm1, %v440_v2 }
  0xd9   :  { %398 = vmatmul.mubr.msk.f32.gmra.mxu1 %vm167_vm3, %v147_v29 }
  0xda   :  { %400 = vmatprep.mubr.msk.f32.mxu1 %vm441_vm1, %v440_v2 }
  0xdd   :  { %401 = vmatmul.mubr.msk.f32.gmra.mxu1 %vm167_vm3, %v148_v30 }
 0x195   :  { %v243_v31 = vpop.f32.mrf.mxu1 }
 0x196   :  { %v244_v42 = vadd.f32 %v243_v31, %v155_v40 }
 0x197   :  { %v396_v32 = vpop.f32.mrf.mxu1 }
 0x198   :  { %v257_v45 = vmax.f32 %v244_v42, 0.0 }
 0x199   :  { %v248_v34 = vpop.f32.mrf.mxu1 }
 0x19a   :  { %v249_v38 = vadd.f32 %v248_v34, %v160_v36 }
 0x19b   :  { %v399_v35 = vpop.f32.mrf.mxu1 }
 0x19c   :  { %v258_v44 = vmax.f32 %v249_v38, 0.0 }
 0x19d   :  { %v253_v37 = vpop.f32.mrf.mxu1 }
 0x19e   :  { %v254_v39 = vadd.f32 %v253_v37, %v165_v33 }
 0x19f   :  { %v402_v41 = vpop.f32.mrf.mxu1 }
 0x1a0   :  { %v259_v43 = vmax.f32 %v254_v39, 0.0 }
 0x1a2   :  { %404 = vmatpush3.msra.mxu0 %v259_v43 }
 0x1a3   :  { %405 = vmatprep.subr.mxu0 %v440_v2 }
 0x1a4   :  { %406 = vmatpush3.msra.mxu0 %v258_v44 }
 0x1a5   :  { %407 = vmatprep.subr.mxu0 %v440_v2 }
 0x1a6   :  { %408 = vmatpush3.msra.mxu0 %v257_v45 }
 0x1a7   :  { %410 = vmatmul.mubr.msk.f32.vlgmr.msra.gmra.mxu0 %vm167_vm3, %v260_v46 }
 0x267   :  { %v336_v48 = vpop.f32.mrf.mxu0 }
 0x268   :  { %v337_v49 = vadd.f32 %v336_v48, %v265_v47 }
 0x269   :  { %v411_v50 = vpop.f32.mrf.mxu0 }
 0x26a   :  { %340 = vst [vmem:[#allocation2] sm:$0xff] %v337_v49 }
 0x26b   :  { %429 = shalt.err (!%p426_p4)
}
 0x26c   :  { %350 = dma.vmem_to_hbm [thread:$0]  %s348_s26, 128, %s567_s7, [#allocation3]  }
 0x26d   :  { %438 = dma.done.wait [#allocation3], 128  }
 0x26e   :  { %439 = vsyncadd [#allocation3], 4294967168 }
 0x26f   :  { %354 = vsyncpa [#allocation3], 1 }

</bundles_post_ra>
